<compile_context>
chip_gen: v6e
topology: v6e:2x2x1
jax: 0.10.0
libtpu: 0.0.40
codegen_flags: <defaults>
</compile_context>

<pallas_src>
import math

import jax
import jax.numpy as jnp
from jax.experimental import pallas as pl
from jax.experimental.pallas import tpu as pltpu

_EPS = 1e-5
_LANE = 128
_MATMUL_DTYPE = jnp.bfloat16  # MXU-native operands; accumulation stays f32.


def _round_up(x, m):
    return (x + m - 1) // m * m


# ----------------------------------------------------------------------------
# Fused kernel factory: one kernel for the entire MLP head.
# Ref order: x, (w, b, gamma, beta) * n_hidden, w_out, b_out, out
# ----------------------------------------------------------------------------
def _make_fused_mlp_kernel(n_hidden):
    def kernel(x_ref, *refs):
        out_ref = refs[-1]
        h = x_ref[...].astype(jnp.float32)

        idx = 0
        for _ in range(n_hidden):
            w_ref, b_ref, g_ref, beta_ref = refs[idx:idx + 4]
            idx += 4
            # Linear: bf16 operands, f32 accumulation on the MXU.
            z = jnp.dot(h.astype(w_ref.dtype), w_ref[...],
                        preferred_element_type=jnp.float32)
            z = z + b_ref[...]
            # BatchNorm1d over the batch dim (training-mode stats), f32 math.
            mean = jnp.mean(z, axis=0, keepdims=True)
            c = z - mean
            var = jnp.mean(c * c, axis=0, keepdims=True)  # biased variance
            z = c * jax.lax.rsqrt(var + _EPS) * g_ref[...] + beta_ref[...]
            # ReLU
            h = jnp.maximum(z, 0.0)

        # Output Linear.
        w_ref, b_ref = refs[idx], refs[idx + 1]
        y = jnp.dot(h.astype(w_ref.dtype), w_ref[...],
                    preferred_element_type=jnp.float32) + b_ref[...]
        out_ref[...] = y.astype(out_ref.dtype)

    return kernel


# ----------------------------------------------------------------------------
# Wrapper: single pallas_call for the whole forward pass.
# ----------------------------------------------------------------------------
def mlp_head_forward(params, x):
    n, f0 = x.shape
    f0p = params["in_features_padded"]
    if f0 != f0p:
        x = jnp.pad(x, ((0, 0), (0, f0p - f0)))

    flat_inputs = [x]
    for (w, b, g, be) in params["hidden"]:
        flat_inputs += [w, b, g, be]
    w_out, b_out = params["out"]
    flat_inputs += [w_out, b_out]
    cp = w_out.shape[1]  # padded (lane-dense) class dim

    # Size the VMEM limit from the actual working set (inputs + output,
    # x2 margin for buffering + 4 MiB headroom), clamped to a v7x-safe range.
    working_set = sum(int(a.size) * a.dtype.itemsize for a in flat_inputs)
    working_set += n * cp * 4  # output
    vmem_limit = min(max(2 * working_set + (4 << 20), 32 << 20), 48 << 20)

    kernel = _make_fused_mlp_kernel(len(params["hidden"]))
    out = pl.pallas_call(
        kernel,
        out_shape=jax.ShapeDtypeStruct((n, cp), jnp.float32),
        in_specs=[pl.BlockSpec(memory_space=pltpu.VMEM)] * len(flat_inputs),
        out_specs=pl.BlockSpec(memory_space=pltpu.VMEM),
        compiler_params=pltpu.CompilerParams(vmem_limit_bytes=vmem_limit),
    )(*flat_inputs)

    return out[:, : params["n_classes"]]


# ----------------------------------------------------------------------------
# Parameter init: PyTorch nn.Linear-style init, then zero-pad every feature dim
# to a multiple of 128 and store matmul weights in bf16.
# ----------------------------------------------------------------------------
def init_mlp_head_params(key, input_size, n_classes, n_layers, hidden_size):
    f0p = _round_up(input_size, _LANE)
    hp = _round_up(hidden_size, _LANE)
    cp = _round_up(n_classes, _LANE)

    params = {"hidden": [], "out": None,
              "n_classes": n_classes, "in_features_padded": f0p}

    def linear_init(k, fan_in, fan_out, fan_in_p, fan_out_p):
        kw, kb = jax.random.split(k)
        bound = 1.0 / math.sqrt(fan_in)
        w = jax.random.uniform(kw, (fan_in, fan_out), jnp.float32, -bound, bound)
        b = jax.random.uniform(kb, (1, fan_out), jnp.float32, -bound, bound)
        w = jnp.pad(w, ((0, fan_in_p - fan_in), (0, fan_out_p - fan_out)))
        b = jnp.pad(b, ((0, 0), (0, fan_out_p - fan_out)))
        return w.astype(_MATMUL_DTYPE), b

    if n_layers == 1:
        params["out"] = linear_init(key, input_size, n_classes, f0p, cp)
        return params

    feat, featp = input_size, f0p
    keys = jax.random.split(key, n_layers)
    for i in range(n_layers - 1):
        w, b = linear_init(keys[i], feat, hidden_size, featp, hp)
        # gamma = 1 on real features, 0 on padded features (keeps padding at 0).
        gamma = jnp.pad(jnp.ones((1, hidden_size), jnp.float32),
                        ((0, 0), (0, hp - hidden_size)))
        beta = jnp.zeros((1, hp), jnp.float32)
        params["hidden"].append((w, b, gamma, beta))
        feat, featp = hidden_size, hp
    params["out"] = linear_init(keys[-1], feat, n_classes, featp, cp)
    return params


# ----------------------------------------------------------------------------
# Pure-JAX references for correctness checks.
# ----------------------------------------------------------------------------
def mlp_head_reference(params, x):
    """Same math / same bf16 operand precision as the kernel (tight check)."""
    f0p = params["in_features_padded"]
    n, f0 = x.shape
    if f0 != f0p:
        x = jnp.pad(x, ((0, 0), (0, f0p - f0)))
    h = x.astype(jnp.float32)
    for (w, b, g, be) in params["hidden"]:
        z = jnp.dot(h.astype(w.dtype), w, preferred_element_type=jnp.float32) + b
        mean = jnp.mean(z, axis=0, keepdims=True)
        var = jnp.mean((z - mean) ** 2, axis=0, keepdims=True)
        z = (z - mean) * jax.lax.rsqrt(var + _EPS) * g + be
        h = jnp.maximum(z, 0.0)
    w_out, b_out = params["out"]
    y = jnp.dot(h.astype(w_out.dtype), w_out,
                preferred_element_type=jnp.float32) + b_out
    return y[:, : params["n_classes"]]


def mlp_head_reference_f32(params, x):
    """Full-f32 semantics check (looser tolerance vs bf16 kernel)."""
    f0p = params["in_features_padded"]
    n, f0 = x.shape
    if f0 != f0p:
        x = jnp.pad(x, ((0, 0), (0, f0p - f0)))
    h = x.astype(jnp.float32)
    for (w, b, g, be) in params["hidden"]:
        z = h @ w.astype(jnp.float32) + b
        mean = jnp.mean(z, axis=0, keepdims=True)
        var = jnp.mean((z - mean) ** 2, axis=0, keepdims=True)
        z = (z - mean) / jnp.sqrt(var + _EPS) * g + be
        h = jnp.maximum(z, 0.0)
    w_out, b_out = params["out"]
    y = h @ w_out.astype(jnp.float32) + b_out
    return y[:, : params["n_classes"]]


if __name__ == "__main__":
    # Small deterministic example consistent with MLPHead's forward: x is
    # (batch, input_size).  NOTE: at these shapes the MXU is ~empty; real
    # deployments should batch enough rows (>=128) to reach the roofline.
    batch = 8
    input_size = 32
    hidden_size = 32
    n_classes = 4
    n_layers = 3  # two (Linear -> BN -> ReLU) blocks + output Linear

    key = jax.random.PRNGKey(0)
    k_x, k_p = jax.random.split(key)
    x = jax.random.normal(k_x, (batch, input_size), jnp.float32)

    params = init_mlp_head_params(k_p, input_size, n_classes, n_layers, hidden_size)

    out = mlp_head_forward(params, x)
    out = jax.block_until_ready(out)
    assert out.shape == (batch, n_classes)

    ref_same_precision = mlp_head_reference(params, x)
    assert jnp.allclose(out, ref_same_precision, atol=2e-3, rtol=2e-3), \
        "mismatch vs bf16-precision reference"

    ref_f32 = mlp_head_reference_f32(params, x)
    assert jnp.allclose(out, ref_f32, atol=5e-2, rtol=5e-2), \
        "mismatch vs f32 semantic reference"

    print("KERNEL_OK")
</pallas_src>

<mosaic_0001>
module attributes {stable_mosaic.version = 11 : i64} {
  func.func @kernel(%arg0: memref<8x128xf32, #tpu.memory_space<vmem>>, %arg1: memref<128x128xbf16, #tpu.memory_space<vmem>>, %arg2: memref<1x128xf32, #tpu.memory_space<vmem>>, %arg3: memref<1x128xf32, #tpu.memory_space<vmem>>, %arg4: memref<1x128xf32, #tpu.memory_space<vmem>>, %arg5: memref<128x128xbf16, #tpu.memory_space<vmem>>, %arg6: memref<1x128xf32, #tpu.memory_space<vmem>>, %arg7: memref<1x128xf32, #tpu.memory_space<vmem>>, %arg8: memref<1x128xf32, #tpu.memory_space<vmem>>, %arg9: memref<128x128xbf16, #tpu.memory_space<vmem>>, %arg10: memref<1x128xf32, #tpu.memory_space<vmem>>, %arg11: memref<8x128xf32, #tpu.memory_space<vmem>>) attributes {dimension_semantics = [], scalar_prefetch = 0 : i64, scratch_operands = 0 : i64, tpu.core_type = #tpu.core_type<tc>} {
    %c0 = arith.constant 0 : index
    %c0_0 = arith.constant 0 : index
    %0 = vector.load %arg0[%c0, %c0_0] : memref<8x128xf32, #tpu.memory_space<vmem>>, vector<8x128xf32>
    %1 = arith.truncf %0 : vector<8x128xf32> to vector<8x128xbf16>
    %c0_1 = arith.constant 0 : index
    %c0_2 = arith.constant 0 : index
    %2 = vector.load %arg1[%c0_1, %c0_2] : memref<128x128xbf16, #tpu.memory_space<vmem>>, vector<128x128xbf16>
    %cst = arith.constant dense<0.000000e+00> : vector<8x128xf32>
    %3 = tpu.matmul %1, %2, %cst {dimension_numbers = #tpu.dot_dimension_numbers<[1], [0], [0], [1], [0, 0, 1, 1], [], []>} : vector<8x128xbf16>, vector<128x128xbf16>, vector<8x128xf32> -> vector<8x128xf32>
    %c0_3 = arith.constant 0 : index
    %c0_4 = arith.constant 0 : index
    %4 = vector.load %arg2[%c0_3, %c0_4] : memref<1x128xf32, #tpu.memory_space<vmem>>, vector<1x128xf32>
    %5 = vector.broadcast %4 : vector<1x128xf32> to vector<8x128xf32>
    %6 = arith.addf %3, %5 : vector<8x128xf32>
    %cst_5 = arith.constant dense<0.000000e+00> : vector<128xf32>
    %7 = vector.multi_reduction <add>, %6, %cst_5 [0] : vector<8x128xf32> to vector<128xf32>
    %8 = vector.shape_cast %7 : vector<128xf32> to vector<1x128xf32>
    %cst_6 = arith.constant 8.000000e+00 : f32
    %9 = vector.broadcast %cst_6 : f32 to vector<1x128xf32>
    %10 = arith.divf %8, %9 : vector<1x128xf32>
    %11 = vector.broadcast %10 : vector<1x128xf32> to vector<8x128xf32>
    %12 = arith.subf %6, %11 : vector<8x128xf32>
    %13 = arith.mulf %12, %12 : vector<8x128xf32>
    %cst_7 = arith.constant dense<0.000000e+00> : vector<128xf32>
    %14 = vector.multi_reduction <add>, %13, %cst_7 [0] : vector<8x128xf32> to vector<128xf32>
    %15 = vector.shape_cast %14 : vector<128xf32> to vector<1x128xf32>
    %cst_8 = arith.constant 8.000000e+00 : f32
    %16 = vector.broadcast %cst_8 : f32 to vector<1x128xf32>
    %17 = arith.divf %15, %16 : vector<1x128xf32>
    %cst_9 = arith.constant 9.99999974E-6 : f32
    %18 = vector.broadcast %cst_9 : f32 to vector<1x128xf32>
    %19 = arith.addf %17, %18 : vector<1x128xf32>
    %20 = math.rsqrt %19 : vector<1x128xf32>
    %21 = vector.broadcast %20 : vector<1x128xf32> to vector<8x128xf32>
    %22 = arith.mulf %12, %21 : vector<8x128xf32>
    %c0_10 = arith.constant 0 : index
    %c0_11 = arith.constant 0 : index
    %23 = vector.load %arg3[%c0_10, %c0_11] : memref<1x128xf32, #tpu.memory_space<vmem>>, vector<1x128xf32>
    %24 = vector.broadcast %23 : vector<1x128xf32> to vector<8x128xf32>
    %25 = arith.mulf %22, %24 : vector<8x128xf32>
    %c0_12 = arith.constant 0 : index
    %c0_13 = arith.constant 0 : index
    %26 = vector.load %arg4[%c0_12, %c0_13] : memref<1x128xf32, #tpu.memory_space<vmem>>, vector<1x128xf32>
    %27 = vector.broadcast %26 : vector<1x128xf32> to vector<8x128xf32>
    %28 = arith.addf %25, %27 : vector<8x128xf32>
    %cst_14 = arith.constant 0.000000e+00 : f32
    %29 = vector.broadcast %cst_14 : f32 to vector<8x128xf32>
    %30 = arith.maximumf %28, %29 : vector<8x128xf32>
    %31 = arith.truncf %30 : vector<8x128xf32> to vector<8x128xbf16>
    %c0_15 = arith.constant 0 : index
    %c0_16 = arith.constant 0 : index
    %32 = vector.load %arg5[%c0_15, %c0_16] : memref<128x128xbf16, #tpu.memory_space<vmem>>, vector<128x128xbf16>
    %cst_17 = arith.constant dense<0.000000e+00> : vector<8x128xf32>
    %33 = tpu.matmul %31, %32, %cst_17 {dimension_numbers = #tpu.dot_dimension_numbers<[1], [0], [0], [1], [0, 0, 1, 1], [], []>} : vector<8x128xbf16>, vector<128x128xbf16>, vector<8x128xf32> -> vector<8x128xf32>
    %c0_18 = arith.constant 0 : index
    %c0_19 = arith.constant 0 : index
    %34 = vector.load %arg6[%c0_18, %c0_19] : memref<1x128xf32, #tpu.memory_space<vmem>>, vector<1x128xf32>
    %35 = vector.broadcast %34 : vector<1x128xf32> to vector<8x128xf32>
    %36 = arith.addf %33, %35 : vector<8x128xf32>
    %cst_20 = arith.constant dense<0.000000e+00> : vector<128xf32>
    %37 = vector.multi_reduction <add>, %36, %cst_20 [0] : vector<8x128xf32> to vector<128xf32>
    %38 = vector.shape_cast %37 : vector<128xf32> to vector<1x128xf32>
    %cst_21 = arith.constant 8.000000e+00 : f32
    %39 = vector.broadcast %cst_21 : f32 to vector<1x128xf32>
    %40 = arith.divf %38, %39 : vector<1x128xf32>
    %41 = vector.broadcast %40 : vector<1x128xf32> to vector<8x128xf32>
    %42 = arith.subf %36, %41 : vector<8x128xf32>
    %43 = arith.mulf %42, %42 : vector<8x128xf32>
    %cst_22 = arith.constant dense<0.000000e+00> : vector<128xf32>
    %44 = vector.multi_reduction <add>, %43, %cst_22 [0] : vector<8x128xf32> to vector<128xf32>
    %45 = vector.shape_cast %44 : vector<128xf32> to vector<1x128xf32>
    %cst_23 = arith.constant 8.000000e+00 : f32
    %46 = vector.broadcast %cst_23 : f32 to vector<1x128xf32>
    %47 = arith.divf %45, %46 : vector<1x128xf32>
    %cst_24 = arith.constant 9.99999974E-6 : f32
    %48 = vector.broadcast %cst_24 : f32 to vector<1x128xf32>
    %49 = arith.addf %47, %48 : vector<1x128xf32>
    %50 = math.rsqrt %49 : vector<1x128xf32>
    %51 = vector.broadcast %50 : vector<1x128xf32> to vector<8x128xf32>
    %52 = arith.mulf %42, %51 : vector<8x128xf32>
    %c0_25 = arith.constant 0 : index
    %c0_26 = arith.constant 0 : index
    %53 = vector.load %arg7[%c0_25, %c0_26] : memref<1x128xf32, #tpu.memory_space<vmem>>, vector<1x128xf32>
    %54 = vector.broadcast %53 : vector<1x128xf32> to vector<8x128xf32>
    %55 = arith.mulf %52, %54 : vector<8x128xf32>
    %c0_27 = arith.constant 0 : index
    %c0_28 = arith.constant 0 : index
    %56 = vector.load %arg8[%c0_27, %c0_28] : memref<1x128xf32, #tpu.memory_space<vmem>>, vector<1x128xf32>
    %57 = vector.broadcast %56 : vector<1x128xf32> to vector<8x128xf32>
    %58 = arith.addf %55, %57 : vector<8x128xf32>
    %cst_29 = arith.constant 0.000000e+00 : f32
    %59 = vector.broadcast %cst_29 : f32 to vector<8x128xf32>
    %60 = arith.maximumf %58, %59 : vector<8x128xf32>
    %61 = arith.truncf %60 : vector<8x128xf32> to vector<8x128xbf16>
    %c0_30 = arith.constant 0 : index
    %c0_31 = arith.constant 0 : index
    %62 = vector.load %arg9[%c0_30, %c0_31] : memref<128x128xbf16, #tpu.memory_space<vmem>>, vector<128x128xbf16>
    %cst_32 = arith.constant dense<0.000000e+00> : vector<8x128xf32>
    %63 = tpu.matmul %61, %62, %cst_32 {dimension_numbers = #tpu.dot_dimension_numbers<[1], [0], [0], [1], [0, 0, 1, 1], [], []>} : vector<8x128xbf16>, vector<128x128xbf16>, vector<8x128xf32> -> vector<8x128xf32>
    %c0_33 = arith.constant 0 : index
    %c0_34 = arith.constant 0 : index
    %64 = vector.load %arg10[%c0_33, %c0_34] : memref<1x128xf32, #tpu.memory_space<vmem>>, vector<1x128xf32>
    %65 = vector.broadcast %64 : vector<1x128xf32> to vector<8x128xf32>
    %66 = arith.addf %63, %65 : vector<8x128xf32>
    %c0_35 = arith.constant 0 : index
    %c0_36 = arith.constant 0 : index
    %67 = vector.load %arg11[%c0_35, %c0_36] : memref<8x128xf32, #tpu.memory_space<vmem>>, vector<8x128xf32>
    tpu.vector_store %arg11[%c0_35, %c0_36], %66 {strides = array<i32>} : memref<8x128xf32, #tpu.memory_space<vmem>>, vector<8x128xf32>,
    return
  }
}

</mosaic_0001>

<bundles_post_ra>
// kernel: tpu_custom_call.1
= control target key start
LH: loop header
LB: loop body
LE: loop exit
PB: predicated region body
PF: predicated region fallthrough
CT: control target
= control target key end

     0   :  { %16 = vsyncpa [#allocation3], 0  ;;  %s928_s0 = inlined_call_operand.hbm [shape: f32[8,128], index: 0, kind: input, shape index: {}]   ;;  %s929_s1 = inlined_call_operand.hbm [shape: bf16[128,128], index: 1, kind: input, shape index: {}]   ;;  %s930_s2 = inlined_call_operand.vmem [shape: f32[1,128], index: 2, kind: input, shape index: {}]   ;;  %s931_s3 = inlined_call_operand.vmem [shape: f32[1,128], index: 3, kind: input, shape index: {}]   ;;  %s932_s4 = inlined_call_operand.vmem [shape: f32[1,128], index: 4, kind: input, shape index: {}]   ;;  %s933_s5 = inlined_call_operand.hbm [shape: bf16[128,128], index: 5, kind: input, shape index: {}]   ;;  %s934_s6 = inlined_call_operand.vmem [shape: f32[1,128], index: 6, kind: input, shape index: {}]   ;;  %s935_s7 = inlined_call_operand.vmem [shape: f32[1,128], index: 7, kind: input, shape index: {}]   ;;  %s936_s8 = inlined_call_operand.vmem [shape: f32[1,128], index: 8, kind: input, shape index: {}]   ;;  %s937_s9 = inlined_call_operand.hbm [shape: bf16[128,128], index: 9, kind: input, shape index: {}]   ;;  %s938_s10 = inlined_call_operand.vmem [shape: f32[1,128], index: 10, kind: input, shape index: {}]   ;;  %s939_s11 = inlined_call_operand.hbm [shape: f32[8,128], index: 11, kind: output, shape index: {}]  }
   0x1   :  { %17 = vsyncpa [#allocation6], 0 }
   0x2   :  { %18 = vsyncpa [#allocation9], 0 }
   0x3   :  { %19 = vsyncpa [#allocation4], 0  ;;  %s784_s17 = smov [#allocation5]  }
   0x4   :  { %s35_s18 = sshll.u32 %s784_s17, 4  ;;  %s36_s18 = int_to_ptr.vmem [resolvable:$true] %s35_s18 }
   0x5   :  { %s684_s19 = scalar_lea.vmem %s36_s18, 1024  ;;  %p689_p1 = scmp.lt.s32.totalorder %s36_s18, %s36_s18 }
   0x6   :  { %p685_p0 = scmp.ne.s32.totalorder %s36_s18, %s684_s19  ;;  %p690_p2 = scmp.lt.s32.totalorder %s684_s19, %s684_s19 }
   0x8   :  { %p691_p3 = por %p690_p2, %p689_p1 }
   0xa   :  { %p692_p4 = pnand %p691_p3, %p685_p0 }
   0xc   :  { %695 = shalt.err (!%p692_p4)
}
   0xd   :  { %s785_s20 = smov 64   ;;  %s786_s21 = smov 4  }
   0xe   :  { %41 = dma.hbm_to_vmem [thread:$0]  %s929_s1, 1024, %s36_s18, [#allocation6], %s785_s20, %s785_s20, %s786_s21  }
   0xf   :  { %s787_s24 = smov [#allocation2]   ;;  %s788_s26 = smov [#allocation7]  }
  0x10   :  { %s26_s25 = sshll.u32 %s787_s24, 4  ;;  %s53_s27 = sshll.u32 %s788_s26, 4  ;;  %s27_s25 = int_to_ptr.vmem [resolvable:$true] %s26_s25  ;;  %s54_s27 = int_to_ptr.vmem [resolvable:$true] %s53_s27 }
  0x11   :  { %s704_s28 = scalar_lea.vmem %s27_s25, 128  ;;  %p709_p6 = scmp.lt.s32.totalorder %s27_s25, %s27_s25 }
  0x12   :  { %p705_p5 = scmp.ne.s32.totalorder %s27_s25, %s704_s28  ;;  %p710_p7 = scmp.lt.s32.totalorder %s704_s28, %s704_s28 }
  0x14   :  { %p711_p8 = por %p710_p7, %p709_p6 }
  0x16   :  { %p712_p9 = pnand %p711_p8, %p705_p5 }
  0x18   :  { %715 = shalt.err (!%p712_p9)
}
  0x19   :  { %29 = dma.hbm_to_vmem [thread:$0]  %s928_s0, 128, %s27_s25, [#allocation3]  }
  0x1a   :  { %s724_s12 = scalar_lea.vmem %s54_s27, 1024  ;;  %p729_p11 = scmp.lt.s32.totalorder %s54_s27, %s54_s27 }
  0x1b   :  { %p725_p10 = scmp.ne.s32.totalorder %s54_s27, %s724_s12  ;;  %p730_p12 = scmp.lt.s32.totalorder %s724_s12, %s724_s12 }
  0x1d   :  { %p731_p13 = por %p730_p12, %p729_p11 }
  0x1f   :  { %p732_p0 = pnand %p731_p13, %p725_p10 }
  0x21   :  { %735 = shalt.err (!%p732_p0)
}
  0x22   :  { %59 = dma.hbm_to_vmem [thread:$0]  %s933_s5, 1024, %s54_s27, [#allocation6], %s785_s20, %s785_s20, %s786_s21  }
  0x23   :  { %s789_s14 = smov [#allocation8]  }
  0x24   :  { %s71_s15 = sshll.u32 %s789_s14, 4  ;;  %s72_s15 = int_to_ptr.vmem [resolvable:$true] %s71_s15 }
  0x25   :  { %s744_s16 = scalar_lea.vmem %s72_s15, 1024  ;;  %p749_p2 = scmp.lt.s32.totalorder %s72_s15, %s72_s15 }
  0x26   :  { %p745_p1 = scmp.ne.s32.totalorder %s72_s15, %s744_s16  ;;  %p750_p3 = scmp.lt.s32.totalorder %s744_s16, %s744_s16 }
  0x28   :  { %p751_p4 = por %p750_p3, %p749_p2 }
  0x2a   :  { %p752_p5 = pnand %p751_p4, %p745_p1 }
  0x2c   :  { %755 = shalt.err (!%p752_p5)
}
  0x2d   :  { %77 = dma.hbm_to_vmem [thread:$0]  %s937_s9, 1024, %s72_s15, [#allocation9], %s785_s20, %s785_s20, %s786_s21  }
  0x2e   :  { %776 = dma.done.wait [#allocation3], 128  }
  0x2f   :  { %777 = vsyncadd [#allocation3], 4294967168 }
  0x30   :  { %778 = dma.done.wait [#allocation6], 2048  }
  0x31   :  { %779 = vsyncadd [#allocation6], 4294965248 }
  0x32   :  { %780 = dma.done.wait [#allocation9], 1024  }
  0x33   :  { %781 = vsyncadd [#allocation9], 4294966272  ;;  %v790_v0 = vmov 0.0   ;;  %vm791_vm0 = vmmov 0   ;;  %v648_v1 = vld [vmem:[#allocation5 + $0x38] sm:$0xff]   ;;  %v649_v2 = vld [vmem:[#allocation5 + $0x30] sm:$0xff]  }
  0x34   :  { %579 = vmatprep.subr.bf16.mxu0 %v790_v0  ;;  %595 = vmatprep.mubr.msk.bf16.mxu0 %vm791_vm0, %v790_v0  ;;  %v650_v3 = vld [vmem:[#allocation5 + $0x28] sm:$0xff]   ;;  %v651_v4 = vld [vmem:[#allocation5 + $0x20] sm:$0xff]   ;;  %v652_v5 = vld [vmem:[#allocation5 + $0x18] sm:$0xff]   ;;  %s792_s26 = smov [#allocation10]  }
  0x35   :  { %599 = vmatprep.subr.bf16.mxu1 %v790_v0  ;;  %615 = vmatprep.mubr.msk.bf16.mxu1 %vm791_vm0, %v790_v0  ;;  %v653_v6 = vld [vmem:[#allocation5 + $0x10] sm:$0xff]   ;;  %v654_v7 = vld [vmem:[#allocation5 + $0x8] sm:$0xff]   ;;  %v655_v8 = vld [vmem:[#allocation5] sm:$0xff]   ;;  %s510_s27 = sshll.u32 %s792_s26, 4  ;;  %s511_s27 = int_to_ptr.vmem [resolvable:$true] %s510_s27 }
  0x36   :  { %580 = vmatpush3.bf16.msra.mxu0 %v648_v1  ;;  %v93_v9 = vld [vmem:[#allocation2] sm:$0xff]  ;;  %v657_v12 = vld [vmem:[#allocation7 + $0x30] sm:$0xff]   ;;  %v658_v13 = vld [vmem:[#allocation7 + $0x28] sm:$0xff]   ;;  %p761_p7 = scmp.lt.s32.totalorder %s511_s27, %s511_s27 }
  0x37   :  { %581 = vmatprep.subr.bf16.mxu0 %v790_v0  ;;  %v94_v10 = vpack.c.bf16 %v93_v9, %v93_v9  ;;  %v656_v11 = vld [vmem:[#allocation7 + $0x38] sm:$0xff]   ;;  %v659_v14 = vld [vmem:[#allocation7 + $0x20] sm:$0xff]   ;;  %v661_v16 = vld [vmem:[#allocation7 + $0x10] sm:$0xff]  }
  0x38   :  { %600 = vmatpush3.bf16.msra.mxu1 %v656_v11  ;;  %v660_v15 = vld [vmem:[#allocation7 + $0x18] sm:$0xff]   ;;  %v662_v17 = vld [vmem:[#allocation7 + $0x8] sm:$0xff]   ;;  %v663_v18 = vld [vmem:[#allocation7] sm:$0xff]  }
  0x39   :  { %601 = vmatprep.subr.bf16.mxu1 %v790_v0  ;;  %v521_v19 = vld [vmem:[%s930_s2] ss:$0 sm:$0xff]  ;;  %v665_v51 = vld [vmem:[#allocation8 + $0x30] sm:$0xff]   ;;  %v666_v52 = vld [vmem:[#allocation8 + $0x28] sm:$0xff]  }
  0x3a   :  { %582 = vmatpush3.bf16.msra.mxu0 %v649_v2  ;;  %v530_v43 = vld [vmem:[%s931_s3] ss:$0 sm:$0xff]  ;;  %v667_v53 = vld [vmem:[#allocation8 + $0x20] sm:$0xff]   ;;  %v669_v55 = vld [vmem:[#allocation8 + $0x10] sm:$0xff]  }
  0x3b   :  { %583 = vmatprep.subr.bf16.mxu0 %v790_v0  ;;  %v531_v45 = vld [vmem:[%s932_s4] ss:$0 sm:$0xff]  ;;  %v670_v56 = vld [vmem:[#allocation8 + $0x8] sm:$0xff]   ;;  %v671_v57 = vld [vmem:[#allocation8] sm:$0xff]  }
  0x3c   :  { %602 = vmatpush3.bf16.msra.mxu1 %v657_v12  ;;  %v664_v50 = vld [vmem:[#allocation8 + $0x38] sm:$0xff]  }
  0x3d   :  { %603 = vmatprep.subr.bf16.mxu1 %v790_v0  ;;  %v668_v54 = vld [vmem:[#allocation8 + $0x18] sm:$0xff]  }
  0x3e   :  { %584 = vmatpush3.bf16.msra.mxu0 %v650_v3  ;;  %v532_v58 = vld [vmem:[%s934_s6] ss:$0 sm:$0xff] }
  0x3f   :  { %585 = vmatprep.subr.bf16.mxu0 %v790_v0 }
  0x40   :  { %604 = vmatpush3.bf16.msra.mxu1 %v658_v13 }
  0x41   :  { %605 = vmatprep.subr.bf16.mxu1 %v790_v0 }
  0x42   :  { %586 = vmatpush3.bf16.msra.mxu0 %v651_v4 }
  0x43   :  { %587 = vmatprep.subr.bf16.mxu0 %v790_v0 }
  0x44   :  { %606 = vmatpush3.bf16.msra.mxu1 %v659_v14 }
  0x45   :  { %607 = vmatprep.subr.bf16.mxu1 %v790_v0 }
  0x46   :  { %588 = vmatpush3.bf16.msra.mxu0 %v652_v5 }
  0x47   :  { %589 = vmatprep.subr.bf16.mxu0 %v790_v0 }
  0x48   :  { %608 = vmatpush3.bf16.msra.mxu1 %v660_v15 }
  0x49   :  { %609 = vmatprep.subr.bf16.mxu1 %v790_v0 }
  0x4a   :  { %590 = vmatpush3.bf16.msra.mxu0 %v653_v6 }
  0x4b   :  { %591 = vmatprep.subr.bf16.mxu0 %v790_v0 }
  0x4c   :  { %610 = vmatpush3.bf16.msra.mxu1 %v661_v16 }
  0x4d   :  { %611 = vmatprep.subr.bf16.mxu1 %v790_v0 }
  0x4e   :  { %592 = vmatpush3.bf16.msra.mxu0 %v654_v7 }
  0x4f   :  { %593 = vmatprep.subr.bf16.mxu0 %v790_v0 }
  0x50   :  { %612 = vmatpush3.bf16.msra.mxu1 %v662_v17 }
  0x51   :  { %613 = vmatprep.subr.bf16.mxu1 %v790_v0 }
  0x52   :  { %594 = vmatpush3.bf16.msra.mxu0 %v655_v8 }
  0x53   :  { %619 = vmatprep.subr.bf16.mxu0 %v790_v0 }
  0x54   :  { %614 = vmatpush3.bf16.msra.mxu1 %v663_v18  ;;  %v541_v18 = vld [vmem:[%s935_s7] ss:$0 sm:$0xff]  ;;  %s756_s7 = scalar_lea.vmem %s511_s27, 128 }
  0x55   :  { %596 = vmatmul.mubr.bf16.vlgmr.msra.gmra.mxu0 %v94_v10  ;;  %p757_p6 = scmp.ne.s32.totalorder %s511_s27, %s756_s7  ;;  %p762_p8 = scmp.lt.s32.totalorder %s756_s7, %s756_s7 }
  0x56   :  { %635 = vmatprep.mubr.msk.bf16.mxu0 %vm791_vm0, %v790_v0  ;;  %620 = vmatpush3.bf16.msra.mxu0 %v664_v50 }
  0x57   :  { %621 = vmatprep.subr.bf16.mxu0 %v790_v0  ;;  %p763_p9 = por %p762_p8, %p761_p7 }
  0x59   :  { %p764_p10 = pnand %p763_p9, %p757_p6 }
  0x5a   :  { %622 = vmatpush3.bf16.msra.mxu0 %v665_v51 }
  0x5b   :  { %623 = vmatprep.subr.bf16.mxu0 %v790_v0 }
  0x5e   :  { %624 = vmatpush3.bf16.msra.mxu0 %v666_v52 }
  0x5f   :  { %625 = vmatprep.subr.bf16.mxu0 %v790_v0 }
  0x62   :  { %626 = vmatpush3.bf16.msra.mxu0 %v667_v53 }
  0x63   :  { %627 = vmatprep.subr.bf16.mxu0 %v790_v0 }
  0x66   :  { %628 = vmatpush3.bf16.msra.mxu0 %v668_v54 }
  0x67   :  { %629 = vmatprep.subr.bf16.mxu0 %v790_v0 }
  0x6a   :  { %630 = vmatpush3.bf16.msra.mxu0 %v669_v55 }
  0x6b   :  { %631 = vmatprep.subr.bf16.mxu0 %v790_v0 }
  0x6e   :  { %632 = vmatpush3.bf16.msra.mxu0 %v670_v56 }
  0x6f   :  { %633 = vmatprep.subr.bf16.mxu0 %v790_v0 }
  0x72   :  { %634 = vmatpush3.bf16.msra.mxu0 %v671_v57 }
 0x115   :  { %v200_v20 = vpop.f32.mrf.mxu0 }
 0x116   :  { %v201_v21 = vadd.f32 %v521_v19, %v200_v20  ;;  %v542_v20 = vld [vmem:[%s936_s8] ss:$0 sm:$0xff] }
 0x117   :  { %v597_v22 = vpop.f32.mrf.mxu0 }
 0x118   :  { %v206_v23 = vrot.slane %v201_v21, 4 }
 0x119   :  { %v203_v24 = vpop.f32.mrf.mxu0 }
 0x11a   :  { %v207_v25 = vadd.f32 %v206_v23, %v201_v21 }
 0x11b   :  { %v598_v26 = vpop.f32.mrf.mxu0 }
 0x11c   :  { %v208_v27 = vrot.slane %v207_v25, 2 }
 0x11e   :  { %v209_v28 = vadd.f32 %v208_v27, %v207_v25  ;;  %v543_v25 = vld [vmem:[%s938_s10] ss:$0 sm:$0xff] }
 0x120   :  { %v210_v29 = vrot.slane %v209_v28, 1 }
 0x122   :  { %v211_v30 = vadd.f32 %v210_v29, %v209_v28 }
 0x124   :  { %v213_v31 = vmul.f32 0.125, %v211_v30 }
 0x126   :  { %v214_v32 = vsub.f32 %v201_v21, %v213_v31 }
 0x128   :  { %v215_v33 = vmul.f32 %v214_v32, %v214_v32 }
 0x12a   :  { %v216_v34 = vrot.slane %v215_v33, 4 }
 0x12c   :  { %v217_v35 = vadd.f32 %v216_v34, %v215_v33 }
 0x12e   :  { %v218_v36 = vrot.slane %v217_v35, 2 }
 0x130   :  { %v219_v37 = vadd.f32 %v218_v36, %v217_v35 }
 0x132   :  { %v220_v38 = vrot.slane %v219_v37, 1 }
 0x134   :  { %v221_v39 = vadd.f32 %v220_v38, %v219_v37 }
 0x136   :  { %v222_v40 = vmul.f32 0.125, %v221_v39 }
 0x138   :  { %v223_v41 = vadd.f32 1e-05, %v222_v40 }
 0x13a   :  { %672 = vrsqrt.f32 %v223_v41 }
 0x147   :  { %v673_v42 = vpop.eup %672 }
 0x148   :  { %v225_v44 = vmul.f32 %v673_v42, %v214_v32 }
 0x14a   :  { %v233_v46 = vmul.f32 %v530_v43, %v225_v44 }
 0x14c   :  { %v241_v47 = vadd.f32 %v531_v45, %v233_v46 }
 0x14e   :  { %v242_v48 = vmax.f32 %v241_v47, 0.0 }
 0x150   :  { %v243_v49 = vpack.c.bf16 %v242_v48, %v242_v48 }
 0x152   :  { %616 = vmatmul.mubr.bf16.vlgmr.msra.gmra.mxu1 %v243_v49 }
 0x212   :  { %v349_v59 = vpop.f32.mrf.mxu1 }
 0x213   :  { %v350_v60 = vadd.f32 %v532_v58, %v349_v59 }
 0x214   :  { %v617_v61 = vpop.f32.mrf.mxu1 }
 0x215   :  { %v355_v62 = vrot.slane %v350_v60, 4 }
 0x216   :  { %v352_v63 = vpop.f32.mrf.mxu1 }
 0x217   :  { %v356_v1 = vadd.f32 %v355_v62, %v350_v60 }
 0x218   :  { %v618_v2 = vpop.f32.mrf.mxu1 }
 0x219   :  { %v357_v3 = vrot.slane %v356_v1, 2 }
 0x21b   :  { %v358_v4 = vadd.f32 %v357_v3, %v356_v1 }
 0x21d   :  { %v359_v5 = vrot.slane %v358_v4, 1 }
 0x21f   :  { %v360_v6 = vadd.f32 %v359_v5, %v358_v4 }
 0x221   :  { %v361_v7 = vmul.f32 0.125, %v360_v6 }
 0x223   :  { %v362_v8 = vsub.f32 %v350_v60, %v361_v7 }
 0x225   :  { %v363_v9 = vmul.f32 %v362_v8, %v362_v8 }
 0x227   :  { %v364_v0 = vrot.slane %v363_v9, 4 }
 0x229   :  { %v365_v10 = vadd.f32 %v364_v0, %v363_v9 }
 0x22b   :  { %v366_v11 = vrot.slane %v365_v10, 2 }
 0x22d   :  { %v367_v12 = vadd.f32 %v366_v11, %v365_v10 }
 0x22f   :  { %v368_v13 = vrot.slane %v367_v12, 1 }
 0x231   :  { %v369_v14 = vadd.f32 %v368_v13, %v367_v12 }
 0x233   :  { %v370_v15 = vmul.f32 0.125, %v369_v14 }
 0x235   :  { %v371_v16 = vadd.f32 1e-05, %v370_v15 }
 0x237   :  { %674 = vrsqrt.f32 %v371_v16 }
 0x244   :  { %v675_v17 = vpop.eup %674 }
 0x245   :  { %v373_v19 = vmul.f32 %v675_v17, %v362_v8 }
 0x247   :  { %v381_v21 = vmul.f32 %v541_v18, %v373_v19 }
 0x249   :  { %v389_v22 = vadd.f32 %v542_v20, %v381_v21 }
 0x24b   :  { %v390_v23 = vmax.f32 %v389_v22, 0.0 }
 0x24d   :  { %v391_v24 = vpack.c.bf16 %v390_v23, %v390_v23 }
 0x24f   :  { %636 = vmatmul.mubr.bf16.vlgmr.msra.gmra.mxu0 %v391_v24 }
 0x30f   :  { %v497_v26 = vpop.f32.mrf.mxu0 }
 0x310   :  { %v498_v27 = vadd.f32 %v543_v25, %v497_v26 }
 0x311   :  { %v637_v28 = vpop.f32.mrf.mxu0 }
 0x312   :  { %503 = vst [vmem:[#allocation10] sm:$0xff] %v498_v27 }
 0x313   :  { %v500_v29 = vpop.f32.mrf.mxu0 }
 0x314   :  { %767 = shalt.err (!%p764_p10)
}
 0x315   :  { %513 = dma.vmem_to_hbm [thread:$0]  %s511_s27, 128, %s939_s11, [#allocation4]   ;;  %v638_v30 = vpop.f32.mrf.mxu0 }
 0x316   :  { %782 = dma.done.wait [#allocation4], 128  }
 0x317   :  { %783 = vsyncadd [#allocation4], 4294967168 }
 0x318   :  { %517 = vsyncpa [#allocation3], 1 }
 0x319   :  { %518 = vsyncpa [#allocation6], 1 }
 0x31a   :  { %519 = vsyncpa [#allocation9], 1 }
 0x31b   :  { %520 = vsyncpa [#allocation4], 1 }

</bundles_post_ra>
